<compile_context>
chip_gen: v5e
topology: v5e:2x2
jax: 0.10.0
libtpu: 0.0.40
codegen_flags: <defaults>
</compile_context>

<pallas_src>
import functools

import jax
import jax.numpy as jnp
from jax.experimental import pallas as pl
from jax.experimental.pallas import tpu as pltpu


def _round_up(x, m):
    return (x + m - 1) // m * m


def _ae_kernel(n_enc, n_layers, x_ref, *refs):
    """x_ref: (tile, P0) bf16; refs = (w_0..w_{L-1}, bias_slab, enc, dec)."""
    w_refs = refs[:n_layers]
    b_ref = refs[n_layers]          # (n_layers, pb_max) f32
    enc_ref = refs[n_layers + 1]    # (tile, P_enc) f32
    dec_ref = refs[n_layers + 2]    # (tile, P_dec) f32

    h = x_ref[...]                  # bf16 activations
    for i in range(n_layers):
        w = w_refs[i][...]          # bf16 (P_in, P_out), static index
        p_out = w.shape[1]
        b = b_ref[i:i + 1, :p_out]  # f32 (1, P_out)
        acc = jnp.dot(h, w, preferred_element_type=jnp.float32) + b
        if i != n_enc - 1 and i != n_layers - 1:
            acc = jnp.maximum(acc, 0.0)      # ReLU between layers only
        if i == n_enc - 1:
            enc_ref[...] = acc.astype(enc_ref.dtype)
        if i == n_layers - 1:
            dec_ref[...] = acc.astype(dec_ref.dtype)
        else:
            h = acc.astype(jnp.bfloat16)     # bf16 operand for next matmul


def ae_forward(x, params, *, batch_tile=None, batch_tile_cap=512):
    """Fused 8-layer autoencoder forward. Returns (encoded, decoded)."""
    B, input_dim = x.shape
    n_layers = len(params)
    n_enc = n_layers // 2
    output_dim = params[n_enc - 1][0].shape[1]

    # Per-layer lane-dense padded feature widths (multiples of 128).
    dims = [input_dim] + [w.shape[1] for w, _ in params]
    p_dims = [_round_up(d, 128) for d in dims]
    p_in0, p_enc, p_dec = p_dims[0], p_dims[n_enc], p_dims[-1]

    # ---- batch tiling: tight tiles, >=2 grid steps when B allows (v7x) ----
    if batch_tile is None:
        n_tiles = max(pl.cdiv(B, batch_tile_cap), min(2, pl.cdiv(B, 16)))
        batch_tile = _round_up(pl.cdiv(B, n_tiles), 16)
    assert batch_tile % 16 == 0, "bf16 activations need 16-row sublane tiles"
    B_pad = _round_up(B, batch_tile)
    grid = (B_pad // batch_tile,)

    # ---- pack operands (zero padding keeps padded lanes exactly 0) --------
    x_pad = jnp.pad(x.astype(jnp.bfloat16),
                    ((0, B_pad - B), (0, p_in0 - input_dim)))

    w_padded = []
    for i, (w, _) in enumerate(params):
        w_padded.append(jnp.pad(w.astype(jnp.bfloat16),
                                ((0, p_dims[i] - w.shape[0]),
                                 (0, p_dims[i + 1] - w.shape[1]))))

    pb_max = max(p_dims[1:])
    b_slab = jnp.zeros((n_layers, pb_max), jnp.float32)
    for i, (_, b) in enumerate(params):
        b_slab = b_slab.at[i, :b.shape[-1]].set(
            b.reshape(-1).astype(jnp.float32))

    # ---- specs -------------------------------------------------------------
    resident = pl.BlockSpec(memory_space=pltpu.MemorySpace.VMEM)  # whole array,
    in_specs = ([pl.BlockSpec((batch_tile, p_in0), lambda i: (i, 0))]
                + [resident] * n_layers         # weights: single-buffered VMEM
                + [resident])                   # bias slab
    out_specs = [pl.BlockSpec((batch_tile, p_enc), lambda i: (i, 0)),
                 pl.BlockSpec((batch_tile, p_dec), lambda i: (i, 0))]
    out_shape = [jax.ShapeDtypeStruct((B_pad, p_enc), jnp.float32),
                 jax.ShapeDtypeStruct((B_pad, p_dec), jnp.float32)]

    # ---- explicit VMEM accounting & cost hint ------------------------------
    w_bytes = sum(wp.size * 2 for wp in w_padded)            # bf16, 1 buffer
    b_bytes = b_slab.size * 4
    in_tile_bytes = 2 * batch_tile * p_in0 * 2                # 2-buffer bf16
    out_tile_bytes = 2 * batch_tile * (p_enc + p_dec) * 4     # 2-buffer f32
    tmp_bytes = 3 * batch_tile * max(p_dims) * 4              # f32 temporaries
    vmem_needed = (w_bytes + b_bytes + in_tile_bytes
                   + out_tile_bytes + tmp_bytes)
    vmem_limit = int(min(64 << 20, max(2 * vmem_needed, 32 << 20)))

    flops = 2 * B_pad * sum(p_dims[i] * p_dims[i + 1] for i in range(n_layers))
    bytes_accessed = (x_pad.size * 2 + w_bytes + b_bytes
                      + B_pad * (p_enc + p_dec) * 4)
    cost = pl.CostEstimate(flops=flops, transcendentals=0,
                           bytes_accessed=int(bytes_accessed))

    kernel = functools.partial(_ae_kernel, n_enc, n_layers)
    encoded_p, decoded_p = pl.pallas_call(
        kernel,
        grid=grid,
        in_specs=in_specs,
        out_specs=out_specs,
        out_shape=out_shape,
        compiler_params=pltpu.CompilerParams(
            dimension_semantics=("parallel",),
            vmem_limit_bytes=vmem_limit,
        ),
        cost_estimate=cost,
    )(x_pad, *w_padded, b_slab)

    # Strip batch + lane padding (padded lanes are exactly 0 throughout).
    encoded = encoded_p[:B, :output_dim].astype(x.dtype)
    decoded = decoded_p[:B, :input_dim].astype(x.dtype)
    return encoded, decoded


def init_linear(key, in_dim, out_dim):
    """Mirrors PyTorch nn.Linear default init (uniform +-1/sqrt(in)).
    Weight is pre-transposed to (in, out); bias is (1, out)."""
    kw, kb = jax.random.split(key)
    bound = 1.0 / jnp.sqrt(jnp.float32(in_dim))
    w = jax.random.uniform(kw, (in_dim, out_dim), jnp.float32, -bound, bound)
    b = jax.random.uniform(kb, (1, out_dim), jnp.float32, -bound, bound)
    return w, b


def make_ae_params(key, input_dim, hid1, hid2, hid3, output_dim):
    dims = [
        # encoder
        (input_dim, hid1), (hid1, hid2), (hid2, hid3), (hid3, output_dim),
        # decoder
        (output_dim, hid3), (hid3, hid2), (hid2, hid1), (hid1, input_dim),
    ]
    keys = jax.random.split(key, len(dims))
    return [init_linear(k, di, do) for k, (di, do) in zip(keys, dims)]


def ae_forward_ref(x, params):
    """Pure-JAX f32 reference for correctness checking."""
    h = x
    for i in range(4):
        w, b = params[i]
        h = h @ w + b
        if i < 3:
            h = jnp.maximum(h, 0.0)
    encoded = h
    for i in range(4, 8):
        w, b = params[i]
        h = h @ w + b
        if i < 7:
            h = jnp.maximum(h, 0.0)
    return encoded, h


if __name__ == "__main__":
    # Small shapes consistent with the module: x is (batch, input_dim).
    batch, input_dim = 32, 64
    hid1, hid2, hid3, output_dim = 32, 16, 8, 4

    key = jax.random.PRNGKey(0)
    k_params, k_x = jax.random.split(key)
    params = make_ae_params(k_params, input_dim, hid1, hid2, hid3, output_dim)
    x = jax.random.normal(k_x, (batch, input_dim), jnp.float32)

    encoded, decoded = jax.jit(ae_forward)(x, params)
    jax.block_until_ready((encoded, decoded))

    enc_ref, dec_ref = ae_forward_ref(x, params)
    assert encoded.shape == (batch, output_dim)
    assert decoded.shape == (batch, input_dim)
    # bf16 operands with f32 accumulation -> loosened tolerance vs f32 ref.
    assert jnp.allclose(encoded, enc_ref, atol=5e-2, rtol=5e-2)
    assert jnp.allclose(decoded, dec_ref, atol=5e-2, rtol=5e-2)

    # TODO(synk): calculate_loss (nn.MSELoss) is trivial elementwise+mean; left in plain JAX.
    print("KERNEL_OK")
</pallas_src>

<mosaic_0001>
module attributes {stable_mosaic.version = 11 : i64} {
  func.func @_ae_kernel(%arg0: i32, %arg1: memref<16x128xbf16, #tpu.memory_space<vmem>>, %arg2: memref<128x128xbf16, #tpu.memory_space<vmem>>, %arg3: memref<128x128xbf16, #tpu.memory_space<vmem>>, %arg4: memref<128x128xbf16, #tpu.memory_space<vmem>>, %arg5: memref<128x128xbf16, #tpu.memory_space<vmem>>, %arg6: memref<128x128xbf16, #tpu.memory_space<vmem>>, %arg7: memref<128x128xbf16, #tpu.memory_space<vmem>>, %arg8: memref<128x128xbf16, #tpu.memory_space<vmem>>, %arg9: memref<128x128xbf16, #tpu.memory_space<vmem>>, %arg10: memref<8x128xf32, #tpu.memory_space<vmem>>, %arg11: memref<16x128xf32, #tpu.memory_space<vmem>>, %arg12: memref<16x128xf32, #tpu.memory_space<vmem>>) attributes {dimension_semantics = [#tpu.dimension_semantics<parallel>], iteration_bounds = array<i64: 2>, scalar_prefetch = 0 : i64, scratch_operands = 0 : i64, tpu.core_type = #tpu.core_type<tc>, window_params = [{transform_indices = @transform_0, window_bounds = array<i64: 16, 128>}, {pipeline_mode = #tpu.pipeline_mode<synchronous>, transform_indices = @transform_1, window_bounds = array<i64: 128, 128>}, {pipeline_mode = #tpu.pipeline_mode<synchronous>, transform_indices = @transform_2, window_bounds = array<i64: 128, 128>}, {pipeline_mode = #tpu.pipeline_mode<synchronous>, transform_indices = @transform_3, window_bounds = array<i64: 128, 128>}, {pipeline_mode = #tpu.pipeline_mode<synchronous>, transform_indices = @transform_4, window_bounds = array<i64: 128, 128>}, {pipeline_mode = #tpu.pipeline_mode<synchronous>, transform_indices = @transform_5, window_bounds = array<i64: 128, 128>}, {pipeline_mode = #tpu.pipeline_mode<synchronous>, transform_indices = @transform_6, window_bounds = array<i64: 128, 128>}, {pipeline_mode = #tpu.pipeline_mode<synchronous>, transform_indices = @transform_7, window_bounds = array<i64: 128, 128>}, {pipeline_mode = #tpu.pipeline_mode<synchronous>, transform_indices = @transform_8, window_bounds = array<i64: 128, 128>}, {pipeline_mode = #tpu.pipeline_mode<synchronous>, transform_indices = @transform_9, window_bounds = array<i64: 8, 128>}, {transform_indices = @transform_10, window_bounds = array<i64: 16, 128>}, {transform_indices = @transform_11, window_bounds = array<i64: 16, 128>}]} {
    %c0 = arith.constant 0 : index
    %c0_0 = arith.constant 0 : index
    %0 = vector.load %arg1[%c0, %c0_0] : memref<16x128xbf16, #tpu.memory_space<vmem>>, vector<16x128xbf16>
    %c0_1 = arith.constant 0 : index
    %c0_2 = arith.constant 0 : index
    %1 = vector.load %arg2[%c0_1, %c0_2] : memref<128x128xbf16, #tpu.memory_space<vmem>>, vector<128x128xbf16>
    %c0_3 = arith.constant 0 : index
    %c0_4 = arith.constant 0 : index
    %2 = vector.load %arg10[%c0_3, %c0_4] : memref<8x128xf32, #tpu.memory_space<vmem>>, vector<1x128xf32>
    %cst = arith.constant dense<0.000000e+00> : vector<16x128xf32>
    %3 = tpu.matmul %0, %1, %cst {dimension_numbers = #tpu.dot_dimension_numbers<[1], [0], [0], [1], [0, 0, 1, 1], [], []>} : vector<16x128xbf16>, vector<128x128xbf16>, vector<16x128xf32> -> vector<16x128xf32>
    %4 = vector.broadcast %2 : vector<1x128xf32> to vector<16x128xf32>
    %5 = arith.addf %3, %4 : vector<16x128xf32>
    %cst_5 = arith.constant 0.000000e+00 : f32
    %6 = vector.broadcast %cst_5 : f32 to vector<16x128xf32>
    %7 = arith.maximumf %5, %6 : vector<16x128xf32>
    %8 = arith.truncf %7 : vector<16x128xf32> to vector<16x128xbf16>
    %c0_6 = arith.constant 0 : index
    %c0_7 = arith.constant 0 : index
    %9 = vector.load %arg3[%c0_6, %c0_7] : memref<128x128xbf16, #tpu.memory_space<vmem>>, vector<128x128xbf16>
    %c1 = arith.constant 1 : index
    %c0_8 = arith.constant 0 : index
    %10 = vector.load %arg10[%c1, %c0_8] : memref<8x128xf32, #tpu.memory_space<vmem>>, vector<1x128xf32>
    %cst_9 = arith.constant dense<0.000000e+00> : vector<16x128xf32>
    %11 = tpu.matmul %8, %9, %cst_9 {dimension_numbers = #tpu.dot_dimension_numbers<[1], [0], [0], [1], [0, 0, 1, 1], [], []>} : vector<16x128xbf16>, vector<128x128xbf16>, vector<16x128xf32> -> vector<16x128xf32>
    %12 = vector.broadcast %10 : vector<1x128xf32> to vector<16x128xf32>
    %13 = arith.addf %11, %12 : vector<16x128xf32>
    %cst_10 = arith.constant 0.000000e+00 : f32
    %14 = vector.broadcast %cst_10 : f32 to vector<16x128xf32>
    %15 = arith.maximumf %13, %14 : vector<16x128xf32>
    %16 = arith.truncf %15 : vector<16x128xf32> to vector<16x128xbf16>
    %c0_11 = arith.constant 0 : index
    %c0_12 = arith.constant 0 : index
    %17 = vector.load %arg4[%c0_11, %c0_12] : memref<128x128xbf16, #tpu.memory_space<vmem>>, vector<128x128xbf16>
    %c2 = arith.constant 2 : index
    %c0_13 = arith.constant 0 : index
    %18 = vector.load %arg10[%c2, %c0_13] : memref<8x128xf32, #tpu.memory_space<vmem>>, vector<1x128xf32>
    %cst_14 = arith.constant dense<0.000000e+00> : vector<16x128xf32>
    %19 = tpu.matmul %16, %17, %cst_14 {dimension_numbers = #tpu.dot_dimension_numbers<[1], [0], [0], [1], [0, 0, 1, 1], [], []>} : vector<16x128xbf16>, vector<128x128xbf16>, vector<16x128xf32> -> vector<16x128xf32>
    %20 = vector.broadcast %18 : vector<1x128xf32> to vector<16x128xf32>
    %21 = arith.addf %19, %20 : vector<16x128xf32>
    %cst_15 = arith.constant 0.000000e+00 : f32
    %22 = vector.broadcast %cst_15 : f32 to vector<16x128xf32>
    %23 = arith.maximumf %21, %22 : vector<16x128xf32>
    %24 = arith.truncf %23 : vector<16x128xf32> to vector<16x128xbf16>
    %c0_16 = arith.constant 0 : index
    %c0_17 = arith.constant 0 : index
    %25 = vector.load %arg5[%c0_16, %c0_17] : memref<128x128xbf16, #tpu.memory_space<vmem>>, vector<128x128xbf16>
    %c3 = arith.constant 3 : index
    %c0_18 = arith.constant 0 : index
    %26 = vector.load %arg10[%c3, %c0_18] : memref<8x128xf32, #tpu.memory_space<vmem>>, vector<1x128xf32>
    %cst_19 = arith.constant dense<0.000000e+00> : vector<16x128xf32>
    %27 = tpu.matmul %24, %25, %cst_19 {dimension_numbers = #tpu.dot_dimension_numbers<[1], [0], [0], [1], [0, 0, 1, 1], [], []>} : vector<16x128xbf16>, vector<128x128xbf16>, vector<16x128xf32> -> vector<16x128xf32>
    %28 = vector.broadcast %26 : vector<1x128xf32> to vector<16x128xf32>
    %29 = arith.addf %27, %28 : vector<16x128xf32>
    %c0_20 = arith.constant 0 : index
    %c0_21 = arith.constant 0 : index
    %30 = vector.load %arg11[%c0_20, %c0_21] : memref<16x128xf32, #tpu.memory_space<vmem>>, vector<16x128xf32>
    tpu.vector_store %arg11[%c0_20, %c0_21], %29 {strides = array<i32>} : memref<16x128xf32, #tpu.memory_space<vmem>>, vector<16x128xf32>,
    %31 = arith.truncf %29 : vector<16x128xf32> to vector<16x128xbf16>
    %c0_22 = arith.constant 0 : index
    %c0_23 = arith.constant 0 : index
    %32 = vector.load %arg6[%c0_22, %c0_23] : memref<128x128xbf16, #tpu.memory_space<vmem>>, vector<128x128xbf16>
    %c4 = arith.constant 4 : index
    %c0_24 = arith.constant 0 : index
    %33 = vector.load %arg10[%c4, %c0_24] : memref<8x128xf32, #tpu.memory_space<vmem>>, vector<1x128xf32>
    %cst_25 = arith.constant dense<0.000000e+00> : vector<16x128xf32>
    %34 = tpu.matmul %31, %32, %cst_25 {dimension_numbers = #tpu.dot_dimension_numbers<[1], [0], [0], [1], [0, 0, 1, 1], [], []>} : vector<16x128xbf16>, vector<128x128xbf16>, vector<16x128xf32> -> vector<16x128xf32>
    %35 = vector.broadcast %33 : vector<1x128xf32> to vector<16x128xf32>
    %36 = arith.addf %34, %35 : vector<16x128xf32>
    %cst_26 = arith.constant 0.000000e+00 : f32
    %37 = vector.broadcast %cst_26 : f32 to vector<16x128xf32>
    %38 = arith.maximumf %36, %37 : vector<16x128xf32>
    %39 = arith.truncf %38 : vector<16x128xf32> to vector<16x128xbf16>
    %c0_27 = arith.constant 0 : index
    %c0_28 = arith.constant 0 : index
    %40 = vector.load %arg7[%c0_27, %c0_28] : memref<128x128xbf16, #tpu.memory_space<vmem>>, vector<128x128xbf16>
    %c5 = arith.constant 5 : index
    %c0_29 = arith.constant 0 : index
    %41 = vector.load %arg10[%c5, %c0_29] : memref<8x128xf32, #tpu.memory_space<vmem>>, vector<1x128xf32>
    %cst_30 = arith.constant dense<0.000000e+00> : vector<16x128xf32>
    %42 = tpu.matmul %39, %40, %cst_30 {dimension_numbers = #tpu.dot_dimension_numbers<[1], [0], [0], [1], [0, 0, 1, 1], [], []>} : vector<16x128xbf16>, vector<128x128xbf16>, vector<16x128xf32> -> vector<16x128xf32>
    %43 = vector.broadcast %41 : vector<1x128xf32> to vector<16x128xf32>
    %44 = arith.addf %42, %43 : vector<16x128xf32>
    %cst_31 = arith.constant 0.000000e+00 : f32
    %45 = vector.broadcast %cst_31 : f32 to vector<16x128xf32>
    %46 = arith.maximumf %44, %45 : vector<16x128xf32>
    %47 = arith.truncf %46 : vector<16x128xf32> to vector<16x128xbf16>
    %c0_32 = arith.constant 0 : index
    %c0_33 = arith.constant 0 : index
    %48 = vector.load %arg8[%c0_32, %c0_33] : memref<128x128xbf16, #tpu.memory_space<vmem>>, vector<128x128xbf16>
    %c6 = arith.constant 6 : index
    %c0_34 = arith.constant 0 : index
    %49 = vector.load %arg10[%c6, %c0_34] : memref<8x128xf32, #tpu.memory_space<vmem>>, vector<1x128xf32>
    %cst_35 = arith.constant dense<0.000000e+00> : vector<16x128xf32>
    %50 = tpu.matmul %47, %48, %cst_35 {dimension_numbers = #tpu.dot_dimension_numbers<[1], [0], [0], [1], [0, 0, 1, 1], [], []>} : vector<16x128xbf16>, vector<128x128xbf16>, vector<16x128xf32> -> vector<16x128xf32>
    %51 = vector.broadcast %49 : vector<1x128xf32> to vector<16x128xf32>
    %52 = arith.addf %50, %51 : vector<16x128xf32>
    %cst_36 = arith.constant 0.000000e+00 : f32
    %53 = vector.broadcast %cst_36 : f32 to vector<16x128xf32>
    %54 = arith.maximumf %52, %53 : vector<16x128xf32>
    %55 = arith.truncf %54 : vector<16x128xf32> to vector<16x128xbf16>
    %c0_37 = arith.constant 0 : index
    %c0_38 = arith.constant 0 : index
    %56 = vector.load %arg9[%c0_37, %c0_38] : memref<128x128xbf16, #tpu.memory_space<vmem>>, vector<128x128xbf16>
    %c7 = arith.constant 7 : index
    %c0_39 = arith.constant 0 : index
    %57 = vector.load %arg10[%c7, %c0_39] : memref<8x128xf32, #tpu.memory_space<vmem>>, vector<1x128xf32>
    %cst_40 = arith.constant dense<0.000000e+00> : vector<16x128xf32>
    %58 = tpu.matmul %55, %56, %cst_40 {dimension_numbers = #tpu.dot_dimension_numbers<[1], [0], [0], [1], [0, 0, 1, 1], [], []>} : vector<16x128xbf16>, vector<128x128xbf16>, vector<16x128xf32> -> vector<16x128xf32>
    %59 = vector.broadcast %57 : vector<1x128xf32> to vector<16x128xf32>
    %60 = arith.addf %58, %59 : vector<16x128xf32>
    %c0_41 = arith.constant 0 : index
    %c0_42 = arith.constant 0 : index
    %61 = vector.load %arg12[%c0_41, %c0_42] : memref<16x128xf32, #tpu.memory_space<vmem>>, vector<16x128xf32>
    tpu.vector_store %arg12[%c0_41, %c0_42], %60 {strides = array<i32>} : memref<16x128xf32, #tpu.memory_space<vmem>>, vector<16x128xf32>,
    return
  }
  func.func @transform_0(%arg0: i32) -> (i32, i32) {
    %c0_i32 = arith.constant 0 : i32
    %c0_i32_0 = arith.constant 0 : i32
    return %arg0, %c0_i32 : i32, i32
  }
  func.func @transform_1(%arg0: i32) -> (i32, i32) {
    %c0_i32 = arith.constant 0 : i32
    %c0_i32_0 = arith.constant 0 : i32
    %c0_i32_1 = arith.constant 0 : i32
    return %c0_i32, %c0_i32_0 : i32, i32
  }
  func.func @transform_2(%arg0: i32) -> (i32, i32) {
    %c0_i32 = arith.constant 0 : i32
    %c0_i32_0 = arith.constant 0 : i32
    %c0_i32_1 = arith.constant 0 : i32
    return %c0_i32, %c0_i32_0 : i32, i32
  }
  func.func @transform_3(%arg0: i32) -> (i32, i32) {
    %c0_i32 = arith.constant 0 : i32
    %c0_i32_0 = arith.constant 0 : i32
    %c0_i32_1 = arith.constant 0 : i32
    return %c0_i32, %c0_i32_0 : i32, i32
  }
  func.func @transform_4(%arg0: i32) -> (i32, i32) {
    %c0_i32 = arith.constant 0 : i32
    %c0_i32_0 = arith.constant 0 : i32
    %c0_i32_1 = arith.constant 0 : i32
    return %c0_i32, %c0_i32_0 : i32, i32
  }
  func.func @transform_5(%arg0: i32) -> (i32, i32) {
    %c0_i32 = arith.constant 0 : i32
    %c0_i32_0 = arith.constant 0 : i32
    %c0_i32_1 = arith.constant 0 : i32
    return %c0_i32, %c0_i32_0 : i32, i32
  }
  func.func @transform_6(%arg0: i32) -> (i32, i32) {
    %c0_i32 = arith.constant 0 : i32
    %c0_i32_0 = arith.constant 0 : i32
    %c0_i32_1 = arith.constant 0 : i32
    return %c0_i32, %c0_i32_0 : i32, i32
  }
  func.func @transform_7(%arg0: i32) -> (i32, i32) {
    %c0_i32 = arith.constant 0 : i32
    %c0_i32_0 = arith.constant 0 : i32
    %c0_i32_1 = arith.constant 0 : i32
    return %c0_i32, %c0_i32_0 : i32, i32
  }
  func.func @transform_8(%arg0: i32) -> (i32, i32) {
    %c0_i32 = arith.constant 0 : i32
    %c0_i32_0 = arith.constant 0 : i32
    %c0_i32_1 = arith.constant 0 : i32
    return %c0_i32, %c0_i32_0 : i32, i32
  }
  func.func @transform_9(%arg0: i32) -> (i32, i32) {
    %c0_i32 = arith.constant 0 : i32
    %c0_i32_0 = arith.constant 0 : i32
    %c0_i32_1 = arith.constant 0 : i32
    return %c0_i32, %c0_i32_0 : i32, i32
  }
  func.func @transform_10(%arg0: i32) -> (i32, i32) {
    %c0_i32 = arith.constant 0 : i32
    %c0_i32_0 = arith.constant 0 : i32
    return %arg0, %c0_i32 : i32, i32
  }
  func.func @transform_11(%arg0: i32) -> (i32, i32) {
    %c0_i32 = arith.constant 0 : i32
    %c0_i32_0 = arith.constant 0 : i32
    return %arg0, %c0_i32 : i32, i32
  }
}

</mosaic_0001>

<bundles_post_ra>
// kernel: ae_forward.1
= control target key start
LH: loop header
LB: loop body
LE: loop exit
PB: predicated region body
PF: predicated region fallthrough
CT: control target
= control target key end

     0   :  { %17 = vsyncpa [#allocation3], 0  ;;  %s2007_s0 = inlined_call_operand.vmem [shape: bf16[32,128], index: 0, kind: input, shape index: {}]   ;;  %s2008_s1 = inlined_call_operand.vmem [shape: bf16[128,128], index: 1, kind: input, shape index: {}]   ;;  %s2009_s2 = inlined_call_operand.vmem [shape: bf16[128,128], index: 2, kind: input, shape index: {}]   ;;  %s2010_s3 = inlined_call_operand.vmem [shape: bf16[128,128], index: 3, kind: input, shape index: {}]   ;;  %s2011_s4 = inlined_call_operand.vmem [shape: bf16[128,128], index: 4, kind: input, shape index: {}]   ;;  %s2012_s5 = inlined_call_operand.vmem [shape: bf16[128,128], index: 5, kind: input, shape index: {}]   ;;  %s2013_s6 = inlined_call_operand.vmem [shape: bf16[128,128], index: 6, kind: input, shape index: {}]   ;;  %s2014_s7 = inlined_call_operand.vmem [shape: bf16[128,128], index: 7, kind: input, shape index: {}]   ;;  %s2015_s8 = inlined_call_operand.vmem [shape: bf16[128,128], index: 8, kind: input, shape index: {}]   ;;  %s2016_s9 = inlined_call_operand.vmem [shape: f32[8,128], index: 9, kind: input, shape index: {}]   ;;  %s2017_s10 = inlined_call_operand.vmem [shape: f32[32,128], index: 10, kind: output, shape index: {0}]   ;;  %s2018_s11 = inlined_call_operand.hbm [shape: f32[32,128], index: 11, kind: output, shape index: {1}]  }
   0x1   :  { %19 = vsyncpa [#allocation3 + $0x1], 0  ;;  %s1700_s17 = smov 0   ;;  %s1702_s18 = smov 0  }
   0x2   :  { %s1704_s19 = smov 0   ;;  %s1706_s20 = smov 0  }
   0x3 LB: > { %2020 = sst [smem:[#allocation5_spill]] %s1632_s19  ;;  %s1721_s21 = sadd.s32 4294967295, %s1636_s20   ;;  %s1636_s20 = sphi %s1706_s20, %s2028_s20   ;;  %s1632_s19 = sphi %s1704_s19, %s2025_s19   ;;  %s1628_s18 = sphi %s1702_s18, %s2027_s18   ;;  %s1624_s17 = sphi %s1700_s17, %s2026_s17  }
   0x4   : > { %s1185_s22 = sadd.s32 4294967294, %s1636_s20   ;;  %s1725_s23 = sadd.s32 1, %s1636_s20  }
   0x5   : > { %s273_s24 = sadd.s32 1, %s1632_s19  ;;  %s270_s25 = ssub.s32 %s1636_s20, %s1725_s23 }
   0x6   : > { %p283_p0 = scmp.ne.s32.totalorder %s1632_s19, %s1628_s18  ;;  %p271_p1 = scmp.eq.s32.totalorder %s270_s25, 0 }
   0x7   : > { %p284_p2 = scmp.eq.s32.totalorder %s1721_s21, 1  ;;  %p289_p3 = scmp.ne.s32.totalorder %s1628_s18, %s1624_s17 }
   0x8   : > { %p290_p4 = scmp.eq.s32.totalorder %s1185_s22, 1  ;;  %p1188_p7 = scmp.ge.s32.totalorder %s1636_s20, 1 }
   0x9   : > { %s1736_s26 = scalar_select %p271_p1, %s1632_s19, %s273_s24  }
   0xa   : > { %p1738_p5 = por %p284_p2, %p283_p0  ;;  %p1742_p6 = por %p290_p4, %p289_p3 }
   0xb   : > { %2021 = sst [smem:[#allocation6_spill]] %s1736_s26  ;;  %p344_p8 = scmp.lt.s32.totalorder %s1636_s20, 3 }
   0xd   : > { %p345_p9 = pnand %p1188_p7, %p344_p8 }
   0xe   : > { %s1190_s14 = sshll.u32 (!%p345_p9), %s1721_s21, 1 }
   0xf   : > { %348 = sbr.rel (%p345_p9) target bundleno = 1194 (0x4aa), region = 60  ;;  %p390_p10 = scmp.lt.s32.totalorder (!%p345_p9), %s1190_s14, 3 }
  0x14   : > { %v1467_v0 = vld [vmem:[%s2008_s1 + $0x38] sm:$0xff]  ;;  %v1466_v1 = vld [vmem:[%s2008_s1 + $0x30] sm:$0xff]  ;;  %v1465_v4 = vld [vmem:[%s2008_s1 + $0x28] sm:$0xff]  ;;  %s2030_s14 = smov (!%p390_p10, %s1190_s14), 3 }
  0x15   : > { %476 = vmatpush.bf16.msra.mxu0 %v1467_v0  ;;  %v1475_v2 = vld [vmem:[%s2009_s2 + $0x38] sm:$0xff]  ;;  %v1474_v3 = vld [vmem:[%s2009_s2 + $0x30] sm:$0xff]  ;;  %v1473_v5 = vld [vmem:[%s2009_s2 + $0x28] sm:$0xff]  ;;  %s1191_s13 = sshll.u32 %s2030_s14, 2  ;;  %s1193_s12 = sshll.u32 %s2030_s14, 3 }
  0x16   : > { %559 = vmatpush.bf16.msra.mxu1 %v1475_v2  ;;  %v1464_v6 = vld [vmem:[%s2008_s1 + $0x20] sm:$0xff]  ;;  %v1463_v8 = vld [vmem:[%s2008_s1 + $0x18] sm:$0xff]  ;;  %v1462_v9 = vld [vmem:[%s2008_s1 + $0x10] sm:$0xff]  ;;  %s393_s26 = scalar_lea.vmem %s2007_s0, %s1191_s13  ;;  %s399_s22 = scalar_lea.vmem %s2017_s10, %s1193_s12 }
  0x17   : > { %v1472_v7 = vld [vmem:[%s2009_s2 + $0x20] sm:$0xff]  ;;  %v1461_v10 = vld [vmem:[%s2008_s1 + $0x8] sm:$0xff]  ;;  %v1471_v13 = vld [vmem:[%s2009_s2 + $0x18] sm:$0xff]  ;;  %s1524_s14 = sshll.u32 %s1721_s21, 4 }
  0x18   : > { %v1460_v11 = vld [vmem:[%s2008_s1] sm:$0xff]  ;;  %v1470_v14 = vld [vmem:[%s2009_s2 + $0x10] sm:$0xff]  ;;  %v1469_v15 = vld [vmem:[%s2009_s2 + $0x8] sm:$0xff]  ;;  %s1094_s19 = scalar_lea.hbm %s2018_s11, %s1524_s14 }
  0x19   : > { %477 = vmatpush.bf16.msra.mxu0 %v1466_v1  ;;  %v1459_v12 = vld [vmem:[%s393_s26] sm:$0xff]  ;;  %v1483_v17 = vld [vmem:[%s2010_s3 + $0x38] sm:$0xff]  ;;  %v1482_v18 = vld [vmem:[%s2010_s3 + $0x30] sm:$0xff]  ;;  %s386_s26 = sand.u32 1, %s1628_s18   ;;  %s1097_s16 = sshll.u32 %s1094_s19, 4  ;;  %s1098_s16 = int_to_ptr.hbm [resolvable:$true] %s1097_s16 }
  0x1a   : > { %560 = vmatpush.bf16.msra.mxu1 %v1474_v3  ;;  %v1468_v16 = vld [vmem:[%s2009_s2] sm:$0xff]  ;;  %642 = vmatpush.bf16.msra.mxu2 %v1483_v17  ;;  %v1481_v19 = vld [vmem:[%s2010_s3 + $0x28] sm:$0xff]  ;;  %v1479_v29 = vld [vmem:[%s2010_s3 + $0x18] sm:$0xff]  ;;  %s1079_s13 = scalar_lea.sflag [#allocation3], %s386_s26  ;;  %s1588_s24 = sshra.s32 %s1098_s16, 4  ;;  %s1589_s24 = int_to_ptr.hbm [resolvable:$true] %s1588_s24 }
  0x1b   : > { %v1480_v20 = vld [vmem:[%s2010_s3 + $0x20] sm:$0xff]  ;;  %v1478_v30 = vld [vmem:[%s2010_s3 + $0x10] sm:$0xff]  ;;  %v1477_v31 = vld [vmem:[%s2010_s3 + $0x8] sm:$0xff]  ;;  %s1590_s21 = scalar_lea.hbm %s1589_s24, 16  ;;  %p1595_p0 = scmp.lt.s32.totalorder %s1589_s24, %s2018_s11 }
  0x1c   : > { %v1566_v22 = vld [vmem:[%s2016_s9] ss:$0 sm:$0xff]  ;;  %v1491_v33 = vld [vmem:[%s2011_s4 + $0x38] sm:$0xff]  ;;  %v1490_v34 = vld [vmem:[%s2011_s4 + $0x30] sm:$0xff]  ;;  %p1591_p11 = scmp.ne.s32.totalorder %s1589_s24, %s1590_s21 }
  0x1d   : > { %478 = vmatpush.bf16.msra.mxu0 %v1465_v4  ;;  %v1476_v32 = vld [vmem:[%s2010_s3] sm:$0xff]  ;;  %725 = vmatpush.bf16.msra.mxu3 %v1491_v33  ;;  %v1489_v35 = vld [vmem:[%s2011_s4 + $0x28] sm:$0xff]  ;;  %v1487_v45 = vld [vmem:[%s2011_s4 + $0x18] sm:$0xff] }
  0x1e   : > { %561 = vmatpush.bf16.msra.mxu1 %v1473_v5  ;;  %643 = vmatpush.bf16.msra.mxu2 %v1482_v18  ;;  %v1488_v36 = vld [vmem:[%s2011_s4 + $0x20] sm:$0xff]  ;;  %v1486_v46 = vld [vmem:[%s2011_s4 + $0x10] sm:$0xff]  ;;  %v1485_v47 = vld [vmem:[%s2011_s4 + $0x8] sm:$0xff]  ;;  %p1592_p12 = pnand %p1591_p11, %p1738_p5 }
  0x1f   : > { %v1567_v38 = vld [vmem:[%s2016_s9 + $0x1] ss:$0 sm:$0xff]  ;;  %v1499_v49 = vld [vmem:[%s2012_s5 + $0x38] sm:$0xff]  ;;  %v1498_v50 = vld [vmem:[%s2012_s5 + $0x30] sm:$0xff] }
  0x20   : > { %v1484_v48 = vld [vmem:[%s2011_s4] sm:$0xff]  ;;  %v1497_v51 = vld [vmem:[%s2012_s5 + $0x28] sm:$0xff]  ;;  %v1495_v53 = vld [vmem:[%s2012_s5 + $0x18] sm:$0xff]  ;;  %p1593_p13 = pneg %p1592_p12 }
  0x21   : > { %479 = vmatpush.bf16.msra.mxu0 %v1464_v6  ;;  %726 = vmatpush.bf16.msra.mxu3 %v1490_v34  ;;  %v1496_v52 = vld [vmem:[%s2012_s5 + $0x20] sm:$0xff]  ;;  %v1494_v62 = vld [vmem:[%s2012_s5 + $0x10] sm:$0xff]  ;;  %v1493_v63 = vld [vmem:[%s2012_s5 + $0x8] sm:$0xff] }
  0x22   : > { %562 = vmatpush.bf16.msra.mxu1 %v1472_v7  ;;  %644 = vmatpush.bf16.msra.mxu2 %v1481_v19  ;;  %v1568_v55 = vld [vmem:[%s2016_s9 + $0x2] ss:$0 sm:$0xff]  ;;  %v1507_v1 = vld [vmem:[%s2013_s6 + $0x38] sm:$0xff]  ;;  %v1506_v2 = vld [vmem:[%s2013_s6 + $0x30] sm:$0xff] }
  0x23   : > { %v1492_v0 = vld [vmem:[%s2012_s5] sm:$0xff]  ;;  %v1505_v3 = vld [vmem:[%s2013_s6 + $0x28] sm:$0xff] }
  0x24   : > { %v1504_v4 = vld [vmem:[%s2013_s6 + $0x20] sm:$0xff]  ;;  %v1513_v17 = vld [vmem:[%s2014_s7 + $0x28] sm:$0xff] }
  0x25   : > { %480 = vmatpush.bf16.msra.mxu0 %v1463_v8  ;;  %727 = vmatpush.bf16.msra.mxu3 %v1489_v35  ;;  %v1569_v5 = vld [vmem:[%s2016_s9 + $0x3] ss:$0 sm:$0xff]  ;;  %v1521_v33 = vld [vmem:[%s2015_s8 + $0x28] sm:$0xff] }
  0x26   : > { %563 = vmatpush.bf16.msra.mxu1 %v1471_v13  ;;  %645 = vmatpush.bf16.msra.mxu2 %v1480_v20  ;;  %v1501_v13 = vld [vmem:[%s2013_s6 + $0x8] sm:$0xff]  ;;  %v1512_v18 = vld [vmem:[%s2014_s7 + $0x20] sm:$0xff] }
  0x27   : > { %v1570_v20 = vld [vmem:[%s2016_s9 + $0x4] ss:$0 sm:$0xff] }
  0x28   : > { %v1520_v34 = vld [vmem:[%s2015_s8 + $0x20] sm:$0xff] }
  0x29   : > { %481 = vmatpush.bf16.msra.mxu0 %v1462_v9  ;;  %728 = vmatpush.bf16.msra.mxu3 %v1488_v36  ;;  %v1571_v36 = vld [vmem:[%s2016_s9 + $0x5] ss:$0 sm:$0xff] }
  0x2a   : > { %564 = vmatpush.bf16.msra.mxu1 %v1470_v14  ;;  %646 = vmatpush.bf16.msra.mxu2 %v1479_v29  ;;  %v1500_v14 = vld [vmem:[%s2013_s6] sm:$0xff]  ;;  %v1509_v29 = vld [vmem:[%s2014_s7 + $0x8] sm:$0xff] }
  0x2d   : > { %482 = vmatpush.bf16.msra.mxu0 %v1461_v10  ;;  %729 = vmatpush.bf16.msra.mxu3 %v1487_v45  ;;  %v1517_v45 = vld [vmem:[%s2015_s8 + $0x8] sm:$0xff] }
  0x2e   : > { %565 = vmatpush.bf16.msra.mxu1 %v1469_v15  ;;  %647 = vmatpush.bf16.msra.mxu2 %v1478_v30  ;;  %v1515_v15 = vld [vmem:[%s2014_s7 + $0x38] sm:$0xff]  ;;  %v1508_v30 = vld [vmem:[%s2014_s7] sm:$0xff] }
  0x31   : > { %483 = vmatpush.bf16.msra.mxu0 %v1460_v11  ;;  %730 = vmatpush.bf16.msra.mxu3 %v1486_v46  ;;  %v1503_v11 = vld [vmem:[%s2013_s6 + $0x18] sm:$0xff]  ;;  %v1516_v46 = vld [vmem:[%s2015_s8] sm:$0xff] }
  0x32   : > { %566 = vmatpush.bf16.msra.mxu1 %v1468_v16  ;;  %648 = vmatpush.bf16.msra.mxu2 %v1477_v31  ;;  %v1514_v16 = vld [vmem:[%s2014_s7 + $0x30] sm:$0xff]  ;;  %v1523_v31 = vld [vmem:[%s2015_s8 + $0x38] sm:$0xff] }
  0x34   : > { %484 = vmatmul.bf16.vlgmr.msra.gmra.mxu0 %v1459_v12  ;;  %v1502_v12 = vld [vmem:[%s2013_s6 + $0x10] sm:$0xff] }
  0x35   : > { %731 = vmatpush.bf16.msra.mxu3 %v1485_v47  ;;  %808 = vmatpush.bf16.msrb.mxu0 %v1499_v49 }
  0x36   : > { %649 = vmatpush.bf16.msra.mxu2 %v1476_v32  ;;  %891 = vmatpush.bf16.msrb.mxu1 %v1507_v1  ;;  %v1522_v32 = vld [vmem:[%s2015_s8 + $0x30] sm:$0xff] }
  0x39   : > { %732 = vmatpush.bf16.msra.mxu3 %v1484_v48  ;;  %809 = vmatpush.bf16.msrb.mxu0 %v1498_v50  ;;  %v1572_v48 = vld [vmem:[%s2016_s9 + $0x6] ss:$0 sm:$0xff] }
  0x3a   : > { %892 = vmatpush.bf16.msrb.mxu1 %v1506_v2  ;;  %974 = vmatpush.bf16.msrb.mxu2 %v1515_v15 }
  0x3d   : > { %810 = vmatpush.bf16.msrb.mxu0 %v1497_v51  ;;  %1057 = vmatpush.bf16.msrb.mxu3 %v1523_v31 }
  0x3e   : > { %893 = vmatpush.bf16.msrb.mxu1 %v1505_v3  ;;  %975 = vmatpush.bf16.msrb.mxu2 %v1514_v16 }
  0x41   : > { %811 = vmatpush.bf16.msrb.mxu0 %v1496_v52  ;;  %1058 = vmatpush.bf16.msrb.mxu3 %v1522_v32 }
  0x42   : > { %894 = vmatpush.bf16.msrb.mxu1 %v1504_v4  ;;  %976 = vmatpush.bf16.msrb.mxu2 %v1513_v17 }
  0x45   : > { %812 = vmatpush.bf16.msrb.mxu0 %v1495_v53  ;;  %1059 = vmatpush.bf16.msrb.mxu3 %v1521_v33 }
  0x46   : > { %895 = vmatpush.bf16.msrb.mxu1 %v1503_v11  ;;  %977 = vmatpush.bf16.msrb.mxu2 %v1512_v18 }
  0x49   : > { %813 = vmatpush.bf16.msrb.mxu0 %v1494_v62  ;;  %1060 = vmatpush.bf16.msrb.mxu3 %v1520_v34 }
  0x4a   : > { %896 = vmatpush.bf16.msrb.mxu1 %v1502_v12 }
  0x4d   : > { %814 = vmatpush.bf16.msrb.mxu0 %v1493_v63 }
  0x4e   : > { %897 = vmatpush.bf16.msrb.mxu1 %v1501_v13 }
  0x51   : > { %815 = vmatpush.bf16.msrb.mxu0 %v1492_v0 }
  0x52   : > { %898 = vmatpush.bf16.msrb.mxu1 %v1500_v14 }
  0xb1   : > { %v485_v21 = vpop.f32.mrf.mxu0 }
  0xb2   : > { %v486_v23 = vadd.f32 %v1566_v22, %v485_v21 }
  0xb4   : > { %v490_v26 = vmax.f32 %v486_v23, 0.0 }
  0xb9   : > { %v487_v24 = vpop.f32.mrf.mxu0 }
  0xba   : > { %v488_v25 = vadd.f32 %v1566_v22, %v487_v24 }
  0xbc   : > { %v491_v27 = vmax.f32 %v488_v25, 0.0 }
  0xbe   : > { %v492_v28 = vpack.c.bf16 %v491_v27, %v490_v26  ;;  %v1511_v27 = vld [vmem:[%s2014_s7 + $0x18] sm:$0xff] }
  0xbf   : > { %978 = vmatpush.bf16.msrb.mxu2 %v1511_v27 }
  0xc0   : > { %567 = vmatmul.bf16.vlgmr.msra.gmra.mxu1 %v492_v28  ;;  %v1510_v28 = vld [vmem:[%s2014_s7 + $0x10] sm:$0xff] }
  0xc3   : > { %979 = vmatpush.bf16.msrb.mxu2 %v1510_v28 }
  0xc7   : > { %980 = vmatpush.bf16.msrb.mxu2 %v1509_v29 }
  0xcb   : > { %981 = vmatpush.bf16.msrb.mxu2 %v1508_v30 }
 0x13d   : > { %v568_v37 = vpop.f32.mrf.mxu1 }
 0x13e   : > { %v569_v39 = vadd.f32 %v1567_v38, %v568_v37 }
 0x140   : > { %v573_v42 = vmax.f32 %v569_v39, 0.0 }
 0x145   : > { %v570_v40 = vpop.f32.mrf.mxu1 }
 0x146   : > { %v571_v41 = vadd.f32 %v1567_v38, %v570_v40 }
 0x148   : > { %v574_v43 = vmax.f32 %v571_v41, 0.0 }
 0x14a   : > { %v575_v44 = vpack.c.bf16 %v574_v43, %v573_v42  ;;  %v1519_v43 = vld [vmem:[%s2015_s8 + $0x18] sm:$0xff] }
 0x14b   : > { %1061 = vmatpush.bf16.msrb.mxu3 %v1519_v43 }
 0x14c   : > { %650 = vmatmul.bf16.vlgmr.msra.gmra.mxu2 %v575_v44  ;;  %v1518_v44 = vld [vmem:[%s2015_s8 + $0x10] sm:$0xff] }
 0x14f   : > { %1062 = vmatpush.bf16.msrb.mxu3 %v1518_v44 }
 0x153   : > { %1063 = vmatpush.bf16.msrb.mxu3 %v1517_v45 }
 0x157   : > { %1064 = vmatpush.bf16.msrb.mxu3 %v1516_v46 }
 0x1cf   : > { %v651_v54 = vpop.f32.mrf.mxu2 }
 0x1d0   : > { %v652_v56 = vadd.f32 %v1568_v55, %v651_v54 }
 0x1d2   : > { %v656_v59 = vmax.f32 %v652_v56, 0.0 }
 0x1d7   : > { %v653_v57 = vpop.f32.mrf.mxu2 }
 0x1d8   : > { %v654_v58 = vadd.f32 %v1568_v55, %v653_v57  ;;  %v1573_v55 = vld [vmem:[%s2016_s9 + $0x7] ss:$0 sm:$0xff] }
 0x1da   : > { %v657_v60 = vmax.f32 %v654_v58, 0.0 }
 0x1dc   : > { %v658_v61 = vpack.c.bf16 %v657_v60, %v656_v59 }
 0x1de   : > { %733 = vmatmul.bf16.vlgmr.msra.gmra.mxu3 %v658_v61 }
 0x261   : > { %v734_v6 = vpop.f32.mrf.mxu3 }
 0x262   : > { %v735_v7 = vadd.f32 %v1569_v5, %v734_v6 }
 0x264   : > { %739 = vst [vmem:[%s399_s22] sm:$0xff] %v735_v7 }
 0x269   : > { %v736_v8 = vpop.f32.mrf.mxu3 }
 0x26a   : > { %v737_v9 = vadd.f32 %v1569_v5, %v736_v8 }
 0x26c   : > { %740 = vst [vmem:[%s399_s22 + $0x8] sm:$0xff] %v737_v9  ;;  %v741_v10 = vpack.c.bf16 %v737_v9, %v735_v7  ;;  %s1189_s22 = sshll.u32 %s386_s26, 4 }
 0x26d   : > { %s388_s12 = scalar_lea.vmem [#allocation2], %s1189_s22  ;;  %s1594_s22 = scalar_lea.hbm %s2018_s11, 32 }
 0x26e   : > { %816 = vmatmul.bf16.vlgmr.msrb.gmra.mxu0 %v741_v10  ;;  %s1095_s15 = sshll.u32 %s388_s12, 4  ;;  %p1596_p1 = scmp.lt.s32.totalorder %s1594_s22, %s1590_s21  ;;  %s1096_s15 = int_to_ptr.vmem [resolvable:$true] %s1095_s15 }
 0x270   : > { %p1597_p2 = por %p1596_p1, %p1595_p0 }
 0x272   : > { %p1598_p3 = pnand %p1597_p2, %p1593_p13 }
 0x2eb   : > { %v817_v19 = vpop.f32.mrf.mxu0 }
 0x2ec   : > { %v818_v21 = vadd.f32 %v1570_v20, %v817_v19 }
 0x2ee   : > { %v822_v24 = vmax.f32 %v818_v21, 0.0 }
 0x2f3   : > { %v819_v22 = vpop.f32.mrf.mxu0 }
 0x2f4   : > { %v820_v23 = vadd.f32 %v1570_v20, %v819_v22 }
 0x2f6   : > { %v823_v25 = vmax.f32 %v820_v23, 0.0 }
 0x2f8   : > { %v824_v26 = vpack.c.bf16 %v823_v25, %v822_v24 }
 0x2fa   : > { %899 = vmatmul.bf16.vlgmr.msrb.gmra.mxu1 %v824_v26 }
 0x377   : > { %v900_v35 = vpop.f32.mrf.mxu1 }
 0x378   : > { %v901_v37 = vadd.f32 %v1571_v36, %v900_v35 }
 0x37a   : > { %v905_v40 = vmax.f32 %v901_v37, 0.0 }
 0x37f   : > { %v902_v38 = vpop.f32.mrf.mxu1 }
 0x380   : > { %v903_v39 = vadd.f32 %v1571_v36, %v902_v38 }
 0x382   : > { %v906_v41 = vmax.f32 %v903_v39, 0.0 }
 0x384   : > { %v907_v42 = vpack.c.bf16 %v906_v41, %v905_v40 }
 0x386   : > { %982 = vmatmul.bf16.vlgmr.msrb.gmra.mxu2 %v907_v42 }
 0x409   : > { %v983_v47 = vpop.f32.mrf.mxu2 }
 0x40a   : > { %v984_v49 = vadd.f32 %v1572_v48, %v983_v47 }
 0x40c   : > { %v988_v52 = vmax.f32 %v984_v49, 0.0 }
 0x411   : > { %v985_v50 = vpop.f32.mrf.mxu2 }
 0x412   : > { %v986_v51 = vadd.f32 %v1572_v48, %v985_v50 }
 0x414   : > { %v989_v53 = vmax.f32 %v986_v51, 0.0 }
 0x416   : > { %v990_v54 = vpack.c.bf16 %v989_v53, %v988_v52 }
 0x418   : > { %1065 = vmatmul.bf16.vlgmr.msrb.gmra.mxu3 %v990_v54 }
 0x49b   : > { %v1066_v56 = vpop.f32.mrf.mxu3 }
 0x49c   : > { %v1067_v57 = vadd.f32 %v1573_v55, %v1066_v56 }
 0x49e   : > { %1071 = vst [vmem:[%s388_s12] sm:$0xff] %v1067_v57 }
 0x4a3   : > { %v1068_v58 = vpop.f32.mrf.mxu3 }
 0x4a4   : > { %v1069_v59 = vadd.f32 %v1573_v55, %v1068_v58 }
 0x4a6   : > { %1072 = vst [vmem:[%s388_s12 + $0x8] sm:$0xff] %v1069_v59 }
 0x4a7   : > { %1601 = shalt.err (!%p1598_p3)
}
 0x4a8   : > { %s1638_s26 = smov 128   ;;  %s1639_s19 = smov 8  }
 0x4a9   : > { %1525 = dma.vmem_to_hbm [thread:$0]  (%p1738_p5), %s1096_s15, 256, %s1098_s16, %s1079_s13, %s1638_s26, %s1638_s26, %s1639_s19  }
 0x4aa PF: > { %p1531_p4 = scmp.ge.s32.totalorder %s1636_s20, 2  ;;  %s1120_s12 = sand.u32 1, %s1624_s17  }
 0x4ab   : > { %s1121_s25 = scalar_lea.sflag [#allocation3], %s1120_s12 }
 0x4ac   : > { %p1528_p7 = pnand %p1531_p4, %p1742_p6 }
 0x4ae   : > { %p1529_p8 = pneg %p1528_p7 }
 0x4b0   : > { %1619 = dma.done.wait (%p1529_p8), %s1121_s25, 256  }
 0x4b1   : > { %1621 = vsyncadd (%p1529_p8), %s1121_s25, 4294967040  ;;  %s2024_s24 = sld [smem:[#allocation5_spill]]  ;;  %p22_p9 = scmp.ge.s32.totalorder %s1725_s23, 4  }
 0x4b2   : > { %s2025_s19 = sld [smem:[#allocation6_spill]]  ;;  %s2026_s17 = smov %s1628_s18 }
 0x4b3   : > { %s2028_s20 = smov %s1725_s23  ;;  %24 = sbr.rel (!%p22_p9) target bundleno = 3 (0x3), region = 107 }
 0x4b7   : > { %s2027_s18 = smov %s2024_s24 }
 0x4b8   :  { %1127 = vsyncpa [#allocation3], 1 }
 0x4b9   :  { %1129 = vsyncpa [#allocation3 + $0x1], 1 }

</bundles_post_ra>
